<compile_context>
chip_gen: v7x
topology: tpu7x:2x2x1
jax: 0.10.0
libtpu: 0.0.40
codegen_flags: <defaults>
</compile_context>

<pallas_src>
import functools

import jax
import jax.numpy as jnp
from jax.experimental import pallas as pl
from jax.experimental.pallas import tpu as pltpu

_LANE = 128  # TPU vreg lane width


# --------------------------------------------------------------------------
# Kernel: fused 5-layer MLP, ReLU between layers, no activation on the last.
# --------------------------------------------------------------------------
def _cdefunc_kernel(z_ref, w0_ref, wh_ref, bh_ref, w4_ref, b4_ref, out_ref):
    # bf16 MXU inputs, f32 accumulate; elementwise epilogue in f32.
    x = z_ref[...].astype(jnp.bfloat16)
    h = jnp.dot(x, w0_ref[...], preferred_element_type=jnp.float32)
    h = jnp.maximum(h + bh_ref[0:1, :], 0.0)
    for i in range(3):  # linear1..linear3, static unroll; wh_ref[i] is a static slice
        h = jnp.dot(h.astype(jnp.bfloat16), wh_ref[i],
                    preferred_element_type=jnp.float32)
        h = jnp.maximum(h + bh_ref[i + 1:i + 2, :], 0.0)
    o = jnp.dot(h.astype(jnp.bfloat16), w4_ref[...],
                preferred_element_type=jnp.float32)
    out_ref[...] = (o + b4_ref[...]).astype(out_ref.dtype)


# --------------------------------------------------------------------------
# One-time parameter preparation (hoisted out of the per-eval hot path).
# --------------------------------------------------------------------------
def prepare_params(params, input_channels, hidden_channels):
    """torch-layout (out,in) weights -> (in,out) bf16, stacked/concatenated.
    Only the final layer's output columns are zero-padded up to a multiple of
    128 lanes (exact zeros, sliced off after the call)."""
    (w0, b0), (w1, b1), (w2, b2), (w3, b3), (w4, b4) = params
    C, H = input_channels, hidden_channels
    HH = w0.shape[0]
    out_cols = C * H
    out_p = ((out_cols + _LANE - 1) // _LANE) * _LANE

    w0p = w0.T.astype(jnp.bfloat16)                                   # (H, HH)
    whp = jnp.stack([w1.T, w2.T, w3.T]).astype(jnp.bfloat16)          # (3, HH, HH)
    bhp = jnp.stack([b0, b1, b2, b3]).astype(jnp.float32)             # (4, HH)
    w4p = jnp.pad(w4.T, ((0, 0), (0, out_p - out_cols))).astype(jnp.bfloat16)  # (HH, out_p)
    b4p = jnp.pad(b4, (0, out_p - out_cols)).reshape(1, out_p).astype(jnp.float32)
    return (w0p, whp, bhp, w4p, b4p)


def _choose_batch_tile(B):
    """Rows per grid step: multiple of 8 (f32 sublane), capped at 1024, and at
    least 2 grid steps when B >= 16 so v7x's two TensorCores both get work."""
    if B <= 8:
        return B
    tb = min(1024, -(-B // 2))          # >= 2 grid steps
    tb = ((tb + 7) // 8) * 8            # sublane-align
    return min(tb, 1024)


# --------------------------------------------------------------------------
# Forward pass (hot path of an ODE solve): pallas_call + cheap slice/reshape.
# --------------------------------------------------------------------------
@functools.partial(jax.jit, static_argnames=("input_channels", "hidden_channels"))
def cdefunc_f_forward(t, z, prepared, input_channels, hidden_channels):
    del t  # unused by the module's forward
    B, H_in = z.shape
    C, H = input_channels, hidden_channels
    assert H_in == H
    w0p, whp, bhp, w4p, b4p = prepared
    HH = w0p.shape[1]
    out_p = w4p.shape[1]
    out_cols = C * H

    TB = _choose_batch_tile(B)
    n_steps = pl.cdiv(B, TB)
    Bp = n_steps * TB
    z_in = jnp.pad(z, ((0, Bp - B), (0, 0))) if Bp != B else z

    # Activations tile over the batch; weights/biases stay VMEM-resident
    # (constant block index across grid steps).
    z_spec = pl.BlockSpec((TB, H), lambda i: (i, 0))
    out_spec = pl.BlockSpec((TB, out_p), lambda i: (i, 0))

    def resident(shape):
        nd = len(shape)
        return pl.BlockSpec(shape, lambda i, _nd=nd: (0,) * _nd)

    flops = 2 * Bp * (H * HH + 3 * HH * HH + HH * out_p)
    bytes_accessed = (4 * (z_in.size + Bp * out_p + bhp.size + b4p.size)
                      + 2 * (w0p.size + whp.size + w4p.size))
    cost = pl.CostEstimate(flops=flops, bytes_accessed=bytes_accessed,
                           transcendentals=0)

    flat = pl.pallas_call(
        _cdefunc_kernel,
        out_shape=jax.ShapeDtypeStruct((Bp, out_p), jnp.float32),
        grid=(n_steps,),
        in_specs=[z_spec,
                  resident(w0p.shape), resident(whp.shape),
                  resident(bhp.shape), resident(w4p.shape), resident(b4p.shape)],
        out_specs=out_spec,
        compiler_params=pltpu.CompilerParams(
            dimension_semantics=("parallel",)),
        cost_estimate=cost,
    )(z_in, w0p, whp, bhp, w4p, b4p)

    # torch: z.view(B, hidden_channels, input_channels) -- flat[b, h*C + c]
    return flat[:B, :out_cols].reshape(B, H, C)


# --------------------------------------------------------------------------
# Init + pure-JAX references (for the correctness check below).
# --------------------------------------------------------------------------
def init_params(key, input_channels, hidden_channels, hidden_hidden_channels):
    """Deterministic torch.nn.Linear-style init (uniform +-1/sqrt(fan_in))."""
    dims = [
        (hidden_channels, hidden_hidden_channels),
        (hidden_hidden_channels, hidden_hidden_channels),
        (hidden_hidden_channels, hidden_hidden_channels),
        (hidden_hidden_channels, hidden_hidden_channels),
        (hidden_hidden_channels, input_channels * hidden_channels),
    ]
    params = []
    for fan_in, fan_out in dims:
        key, kw, kb = jax.random.split(key, 3)
        bound = 1.0 / jnp.sqrt(fan_in)
        w = jax.random.uniform(kw, (fan_out, fan_in), jnp.float32, -bound, bound)
        b = jax.random.uniform(kb, (fan_out,), jnp.float32, -bound, bound)
        params.append((w, b))
    return params


def _reference_forward(z, params, input_channels, hidden_channels,
                       compute_dtype=jnp.float32):
    x = z
    for i, (w, b) in enumerate(params):
        x = jnp.dot(x.astype(compute_dtype), w.T.astype(compute_dtype),
                    preferred_element_type=jnp.float32) + b
        if i < 4:
            x = jnp.maximum(x, 0.0)
    return x.reshape(z.shape[0], hidden_channels, input_channels)


if __name__ == "__main__":
    # Small shapes consistent with the module.
    B = 8                   # batch
    input_channels = 4      # C
    hidden_channels = 32    # H
    hidden_hidden = 32      # HH

    key = jax.random.PRNGKey(0)
    key, kz = jax.random.split(key)
    z = jax.random.normal(kz, (B, hidden_channels), jnp.float32)
    t = jnp.float32(0.0)    # unused by forward

    params = init_params(key, input_channels, hidden_channels, hidden_hidden)
    prepared = prepare_params(params, input_channels, hidden_channels)  # once

    out = cdefunc_f_forward(t, z, prepared, input_channels, hidden_channels)
    out = jax.block_until_ready(out)

    # Exact-path reference (bf16 dot inputs, f32 accumulate) + f32 sanity ref.
    ref_bf16 = _reference_forward(z, params, input_channels, hidden_channels,
                                  compute_dtype=jnp.bfloat16)
    ref_f32 = _reference_forward(z, params, input_channels, hidden_channels,
                                 compute_dtype=jnp.float32)

    assert out.shape == (B, hidden_channels, input_channels), out.shape
    assert jnp.allclose(out, ref_bf16, atol=1e-3, rtol=1e-3), \
        float(jnp.max(jnp.abs(out - ref_bf16)))
    assert jnp.allclose(out, ref_f32, atol=8e-2, rtol=8e-2), \
        float(jnp.max(jnp.abs(out - ref_f32)))
    # TODO(synk): validate bf16-weight vector field against the ODE solver's
    #             adaptive-step tolerance in the full training loop.

    print("KERNEL_OK")
</pallas_src>

<mosaic_0001>
module attributes {stable_mosaic.version = 11 : i64} {
  func.func @_cdefunc_kernel(%arg0: i32, %arg1: memref<8x32xf32, #tpu.memory_space<vmem>>, %arg2: memref<32x32xbf16, #tpu.memory_space<vmem>>, %arg3: memref<3x32x32xbf16, #tpu.memory_space<vmem>>, %arg4: memref<4x32xf32, #tpu.memory_space<vmem>>, %arg5: memref<32x128xbf16, #tpu.memory_space<vmem>>, %arg6: memref<1x128xf32, #tpu.memory_space<vmem>>, %arg7: memref<8x128xf32, #tpu.memory_space<vmem>>) attributes {dimension_semantics = [#tpu.dimension_semantics<parallel>], iteration_bounds = array<i64: 1>, scalar_prefetch = 0 : i64, scratch_operands = 0 : i64, tpu.core_type = #tpu.core_type<tc>, window_params = [{transform_indices = @transform_0, window_bounds = array<i64: 8, 32>}, {pipeline_mode = #tpu.pipeline_mode<synchronous>, transform_indices = @transform_1, window_bounds = array<i64: 32, 32>}, {pipeline_mode = #tpu.pipeline_mode<synchronous>, transform_indices = @transform_2, window_bounds = array<i64: 3, 32, 32>}, {pipeline_mode = #tpu.pipeline_mode<synchronous>, transform_indices = @transform_3, window_bounds = array<i64: 4, 32>}, {pipeline_mode = #tpu.pipeline_mode<synchronous>, transform_indices = @transform_4, window_bounds = array<i64: 32, 128>}, {pipeline_mode = #tpu.pipeline_mode<synchronous>, transform_indices = @transform_5, window_bounds = array<i64: 1, 128>}, {transform_indices = @transform_6, window_bounds = array<i64: 8, 128>}]} {
    %c0 = arith.constant 0 : index
    %c0_0 = arith.constant 0 : index
    %0 = vector.load %arg1[%c0, %c0_0] : memref<8x32xf32, #tpu.memory_space<vmem>>, vector<8x32xf32>
    %1 = arith.truncf %0 : vector<8x32xf32> to vector<8x32xbf16>
    %c0_1 = arith.constant 0 : index
    %c0_2 = arith.constant 0 : index
    %2 = vector.load %arg2[%c0_1, %c0_2] : memref<32x32xbf16, #tpu.memory_space<vmem>>, vector<32x32xbf16>
    %cst = arith.constant dense<0.000000e+00> : vector<8x32xf32>
    %3 = tpu.matmul %1, %2, %cst {dimension_numbers = #tpu.dot_dimension_numbers<[1], [0], [0], [1], [0, 0, 1, 1], [], []>} : vector<8x32xbf16>, vector<32x32xbf16>, vector<8x32xf32> -> vector<8x32xf32>
    %c0_3 = arith.constant 0 : index
    %c0_4 = arith.constant 0 : index
    %4 = vector.load %arg4[%c0_3, %c0_4] : memref<4x32xf32, #tpu.memory_space<vmem>>, vector<1x32xf32>
    %5 = vector.broadcast %4 : vector<1x32xf32> to vector<8x32xf32>
    %6 = arith.addf %3, %5 : vector<8x32xf32>
    %cst_5 = arith.constant 0.000000e+00 : f32
    %7 = vector.broadcast %cst_5 : f32 to vector<8x32xf32>
    %8 = arith.maximumf %6, %7 : vector<8x32xf32>
    %9 = arith.truncf %8 : vector<8x32xf32> to vector<8x32xbf16>
    %c0_6 = arith.constant 0 : index
    %c0_7 = arith.constant 0 : index
    %c0_8 = arith.constant 0 : index
    %10 = vector.load %arg3[%c0_6, %c0_7, %c0_8] : memref<3x32x32xbf16, #tpu.memory_space<vmem>>, vector<1x32x32xbf16>
    %11 = vector.shape_cast %10 : vector<1x32x32xbf16> to vector<32x32xbf16>
    %cst_9 = arith.constant dense<0.000000e+00> : vector<8x32xf32>
    %12 = tpu.matmul %9, %11, %cst_9 {dimension_numbers = #tpu.dot_dimension_numbers<[1], [0], [0], [1], [0, 0, 1, 1], [], []>} : vector<8x32xbf16>, vector<32x32xbf16>, vector<8x32xf32> -> vector<8x32xf32>
    %c1 = arith.constant 1 : index
    %c0_10 = arith.constant 0 : index
    %13 = vector.load %arg4[%c1, %c0_10] : memref<4x32xf32, #tpu.memory_space<vmem>>, vector<1x32xf32>
    %14 = vector.broadcast %13 : vector<1x32xf32> to vector<8x32xf32>
    %15 = arith.addf %12, %14 : vector<8x32xf32>
    %cst_11 = arith.constant 0.000000e+00 : f32
    %16 = vector.broadcast %cst_11 : f32 to vector<8x32xf32>
    %17 = arith.maximumf %15, %16 : vector<8x32xf32>
    %18 = arith.truncf %17 : vector<8x32xf32> to vector<8x32xbf16>
    %c1_12 = arith.constant 1 : index
    %c0_13 = arith.constant 0 : index
    %c0_14 = arith.constant 0 : index
    %19 = vector.load %arg3[%c1_12, %c0_13, %c0_14] : memref<3x32x32xbf16, #tpu.memory_space<vmem>>, vector<1x32x32xbf16>
    %20 = vector.shape_cast %19 : vector<1x32x32xbf16> to vector<32x32xbf16>
    %cst_15 = arith.constant dense<0.000000e+00> : vector<8x32xf32>
    %21 = tpu.matmul %18, %20, %cst_15 {dimension_numbers = #tpu.dot_dimension_numbers<[1], [0], [0], [1], [0, 0, 1, 1], [], []>} : vector<8x32xbf16>, vector<32x32xbf16>, vector<8x32xf32> -> vector<8x32xf32>
    %c2 = arith.constant 2 : index
    %c0_16 = arith.constant 0 : index
    %22 = vector.load %arg4[%c2, %c0_16] : memref<4x32xf32, #tpu.memory_space<vmem>>, vector<1x32xf32>
    %23 = vector.broadcast %22 : vector<1x32xf32> to vector<8x32xf32>
    %24 = arith.addf %21, %23 : vector<8x32xf32>
    %cst_17 = arith.constant 0.000000e+00 : f32
    %25 = vector.broadcast %cst_17 : f32 to vector<8x32xf32>
    %26 = arith.maximumf %24, %25 : vector<8x32xf32>
    %27 = arith.truncf %26 : vector<8x32xf32> to vector<8x32xbf16>
    %c2_18 = arith.constant 2 : index
    %c0_19 = arith.constant 0 : index
    %c0_20 = arith.constant 0 : index
    %28 = vector.load %arg3[%c2_18, %c0_19, %c0_20] : memref<3x32x32xbf16, #tpu.memory_space<vmem>>, vector<1x32x32xbf16>
    %29 = vector.shape_cast %28 : vector<1x32x32xbf16> to vector<32x32xbf16>
    %cst_21 = arith.constant dense<0.000000e+00> : vector<8x32xf32>
    %30 = tpu.matmul %27, %29, %cst_21 {dimension_numbers = #tpu.dot_dimension_numbers<[1], [0], [0], [1], [0, 0, 1, 1], [], []>} : vector<8x32xbf16>, vector<32x32xbf16>, vector<8x32xf32> -> vector<8x32xf32>
    %c3 = arith.constant 3 : index
    %c0_22 = arith.constant 0 : index
    %31 = vector.load %arg4[%c3, %c0_22] : memref<4x32xf32, #tpu.memory_space<vmem>>, vector<1x32xf32>
    %32 = vector.broadcast %31 : vector<1x32xf32> to vector<8x32xf32>
    %33 = arith.addf %30, %32 : vector<8x32xf32>
    %cst_23 = arith.constant 0.000000e+00 : f32
    %34 = vector.broadcast %cst_23 : f32 to vector<8x32xf32>
    %35 = arith.maximumf %33, %34 : vector<8x32xf32>
    %36 = arith.truncf %35 : vector<8x32xf32> to vector<8x32xbf16>
    %c0_24 = arith.constant 0 : index
    %c0_25 = arith.constant 0 : index
    %37 = vector.load %arg5[%c0_24, %c0_25] : memref<32x128xbf16, #tpu.memory_space<vmem>>, vector<32x128xbf16>
    %cst_26 = arith.constant dense<0.000000e+00> : vector<8x128xf32>
    %38 = tpu.matmul %36, %37, %cst_26 {dimension_numbers = #tpu.dot_dimension_numbers<[1], [0], [0], [1], [0, 0, 1, 1], [], []>} : vector<8x32xbf16>, vector<32x128xbf16>, vector<8x128xf32> -> vector<8x128xf32>
    %c0_27 = arith.constant 0 : index
    %c0_28 = arith.constant 0 : index
    %39 = vector.load %arg6[%c0_27, %c0_28] : memref<1x128xf32, #tpu.memory_space<vmem>>, vector<1x128xf32>
    %40 = vector.broadcast %39 : vector<1x128xf32> to vector<8x128xf32>
    %41 = arith.addf %38, %40 : vector<8x128xf32>
    %c0_29 = arith.constant 0 : index
    %c0_30 = arith.constant 0 : index
    %42 = vector.load %arg7[%c0_29, %c0_30] : memref<8x128xf32, #tpu.memory_space<vmem>>, vector<8x128xf32>
    tpu.vector_store %arg7[%c0_29, %c0_30], %41 {strides = array<i32>} : memref<8x128xf32, #tpu.memory_space<vmem>>, vector<8x128xf32>,
    return
  }
  func.func @transform_0(%arg0: i32) -> (i32, i32) {
    %c0_i32 = arith.constant 0 : i32
    %c0_i32_0 = arith.constant 0 : i32
    return %arg0, %c0_i32 : i32, i32
  }
  func.func @transform_1(%arg0: i32) -> (i32, i32) {
    %c0_i32 = arith.constant 0 : i32
    %c0_i32_0 = arith.constant 0 : i32
    %c0_i32_1 = arith.constant 0 : i32
    return %c0_i32, %c0_i32_0 : i32, i32
  }
  func.func @transform_2(%arg0: i32) -> (i32, i32, i32) {
    %c0_i32 = arith.constant 0 : i32
    %c0_i32_0 = arith.constant 0 : i32
    %c0_i32_1 = arith.constant 0 : i32
    %c0_i32_2 = arith.constant 0 : i32
    return %c0_i32, %c0_i32_0, %c0_i32_1 : i32, i32, i32
  }
  func.func @transform_3(%arg0: i32) -> (i32, i32) {
    %c0_i32 = arith.constant 0 : i32
    %c0_i32_0 = arith.constant 0 : i32
    %c0_i32_1 = arith.constant 0 : i32
    return %c0_i32, %c0_i32_0 : i32, i32
  }
  func.func @transform_4(%arg0: i32) -> (i32, i32) {
    %c0_i32 = arith.constant 0 : i32
    %c0_i32_0 = arith.constant 0 : i32
    %c0_i32_1 = arith.constant 0 : i32
    return %c0_i32, %c0_i32_0 : i32, i32
  }
  func.func @transform_5(%arg0: i32) -> (i32, i32) {
    %c0_i32 = arith.constant 0 : i32
    %c0_i32_0 = arith.constant 0 : i32
    %c0_i32_1 = arith.constant 0 : i32
    return %c0_i32, %c0_i32_0 : i32, i32
  }
  func.func @transform_6(%arg0: i32) -> (i32, i32) {
    %c0_i32 = arith.constant 0 : i32
    %c0_i32_0 = arith.constant 0 : i32
    return %arg0, %c0_i32 : i32, i32
  }
}

</mosaic_0001>

<bundles_post_ra>
// kernel: cdefunc_f_forward.1
= control target key start
LH: loop header
LB: loop body
LE: loop exit
PB: predicated region body
PF: predicated region fallthrough
CT: control target
= control target key end

     0   :  { %11 = vsyncpa [#allocation3], 0  ;;  %s735_s0 = inlined_call_operand.hbm [shape: f32[8,32], index: 0, kind: input, shape index: {}]   ;;  %s736_s1 = inlined_call_operand.hbm [shape: bf16[32,32], index: 1, kind: input, shape index: {}]   ;;  %s737_s2 = inlined_call_operand.hbm [shape: bf16[3,32,32], index: 2, kind: input, shape index: {}]   ;;  %s738_s3 = inlined_call_operand.vmem [shape: f32[4,32], index: 3, kind: input, shape index: {}]   ;;  %s739_s4 = inlined_call_operand.hbm [shape: bf16[32,128], index: 4, kind: input, shape index: {}]   ;;  %s740_s5 = inlined_call_operand.vmem [shape: f32[1,128], index: 5, kind: input, shape index: {}]   ;;  %s741_s6 = inlined_call_operand.vmem [shape: f32[8,128], index: 6, kind: output, shape index: {}]  }
   0x1   :  { %12 = vsyncpa [#allocation5], 0 }
   0x2   :  { %13 = vsyncpa [#allocation8], 0  ;;  %s607_s21 = smov [#allocation4]   ;;  %s513_s25 = scalar_lea.hbm %s736_s1, 256 }
   0x3   :  { %s29_s22 = sshll.u32 %s607_s21, 4  ;;  %p514_p0 = scmp.ne.s32.totalorder %s736_s1, %s513_s25  ;;  %s30_s22 = int_to_ptr.vmem [resolvable:$true] %s29_s22 }
   0x4   :  { %p517_p1 = scmp.lt.u32.totalorder %s513_s25, %s736_s1 }
   0x6   :  { %p519_p2 = pnand %p517_p1, %p514_p0 }
   0x8   :  { %522 = shalt.err (!%p519_p2)
}
   0x9   :  { %s523_s30 = scalar_lea.vmem %s30_s22, 256  ;;  %p528_p4 = scmp.lt.s32.totalorder %s30_s22, %s30_s22 }
   0xa   :  { %p524_p3 = scmp.ne.s32.totalorder %s30_s22, %s523_s30  ;;  %p529_p5 = scmp.lt.s32.totalorder %s523_s30, %s523_s30 }
   0xc   :  { %p530_p6 = por %p529_p5, %p528_p4 }
   0xe   :  { %p531_p7 = pnand %p530_p6, %p524_p3 }
  0x10   :  { %534 = shalt.err (!%p531_p7)
}
  0x11   :  { %s608_s7 = smov 64   ;;  %s609_s8 = smov 4  }
  0x12   :  { %35 = dma.hbm_to_vmem [thread:$0]  %s736_s1, 256, %s30_s22, [#allocation5], %s608_s7, %s608_s7, %s609_s8  }
  0x13   :  { %s610_s11 = smov [#allocation2]   ;;  %s611_s13 = smov [#allocation6]  }
  0x14   :  { %s20_s12 = sshll.u32 %s610_s11, 4  ;;  %s41_s14 = sshll.u32 %s611_s13, 4  ;;  %s21_s12 = int_to_ptr.vmem [resolvable:$true] %s20_s12  ;;  %s42_s14 = int_to_ptr.vmem [resolvable:$true] %s41_s14 }
  0x15   :  { %s535_s17 = scalar_lea.hbm %s735_s0, 128 }
  0x16   :  { %p536_p8 = scmp.ne.s32.totalorder %s735_s0, %s535_s17  ;;  %p539_p9 = scmp.lt.u32.totalorder %s535_s17, %s735_s0 }
  0x18   :  { %p541_p10 = pnand %p539_p9, %p536_p8 }
  0x1a   :  { %544 = shalt.err (!%p541_p10)
}
  0x1b   :  { %s545_s1 = scalar_lea.vmem %s21_s12, 128  ;;  %p550_p12 = scmp.lt.s32.totalorder %s21_s12, %s21_s12 }
  0x1c   :  { %p546_p11 = scmp.ne.s32.totalorder %s21_s12, %s545_s1  ;;  %p551_p13 = scmp.lt.s32.totalorder %s545_s1, %s545_s1 }
  0x1e   :  { %p552_p0 = por %p551_p13, %p550_p12 }
  0x20   :  { %p553_p1 = pnand %p552_p0, %p546_p11 }
  0x22   :  { %556 = shalt.err (!%p553_p1)
}
  0x23   :  { %23 = dma.hbm_to_vmem [thread:$0]  %s735_s0, 128, %s21_s12, [#allocation3]  }
  0x24   :  { %s557_s26 = scalar_lea.hbm %s737_s2, 768 }
  0x25   :  { %p558_p2 = scmp.ne.s32.totalorder %s737_s2, %s557_s26  ;;  %p561_p3 = scmp.lt.u32.totalorder %s557_s26, %s737_s2 }
  0x27   :  { %p563_p4 = pnand %p561_p3, %p558_p2 }
  0x29   :  { %566 = shalt.err (!%p563_p4)
}
  0x2a   :  { %s567_s9 = scalar_lea.vmem %s42_s14, 768  ;;  %p572_p6 = scmp.lt.s32.totalorder %s42_s14, %s42_s14 }
  0x2b   :  { %p568_p5 = scmp.ne.s32.totalorder %s42_s14, %s567_s9  ;;  %p573_p7 = scmp.lt.s32.totalorder %s567_s9, %s567_s9 }
  0x2d   :  { %p574_p8 = por %p573_p7, %p572_p6 }
  0x2f   :  { %p575_p9 = pnand %p574_p8, %p568_p5 }
  0x31   :  { %578 = shalt.err (!%p575_p9)
}
  0x32   :  { %47 = dma.hbm_to_vmem [thread:$0]  %s737_s2, 768, %s42_s14, [#allocation5], %s608_s7, %s608_s7, %s609_s8  }
  0x33   :  { %s612_s11 = smov [#allocation7]   ;;  %s579_s16 = scalar_lea.hbm %s739_s4, 256 }
  0x34   :  { %s55_s12 = sshll.u32 %s612_s11, 4  ;;  %p580_p10 = scmp.ne.s32.totalorder %s739_s4, %s579_s16  ;;  %s56_s12 = int_to_ptr.vmem [resolvable:$true] %s55_s12 }
  0x35   :  { %p583_p11 = scmp.lt.u32.totalorder %s579_s16, %s739_s4 }
  0x37   :  { %p585_p12 = pnand %p583_p11, %p580_p10 }
  0x39   :  { %588 = shalt.err (!%p585_p12)
}
  0x3a   :  { %s589_s21 = scalar_lea.vmem %s56_s12, 256  ;;  %p594_p0 = scmp.lt.s32.totalorder %s56_s12, %s56_s12 }
  0x3b   :  { %p590_p13 = scmp.ne.s32.totalorder %s56_s12, %s589_s21  ;;  %p595_p1 = scmp.lt.s32.totalorder %s589_s21, %s589_s21 }
  0x3d   :  { %p596_p2 = por %p595_p1, %p594_p0 }
  0x3f   :  { %p597_p3 = pnand %p596_p2, %p590_p13 }
  0x41   :  { %600 = shalt.err (!%p597_p3)
}
  0x42   :  { %61 = dma.hbm_to_vmem [thread:$0]  %s739_s4, 256, %s56_s12, [#allocation8], %s608_s7, %s608_s7, %s609_s8  }
  0x43   :  { %601 = dma.done.wait [#allocation3], 128  }
  0x44   :  { %602 = vsyncadd [#allocation3], 4294967168 }
  0x45   :  { %603 = dma.done.wait [#allocation5], 1024  }
  0x46   :  { %604 = vsyncadd [#allocation5], 4294966272 }
  0x47   :  { %605 = dma.done.wait [#allocation8], 256  }
  0x48   :  { %606 = vsyncadd [#allocation8], 4294967040  ;;  %v613_v0 = vmov 0.0   ;;  %vm614_vm0 = vmmov 0   ;;  %v503_v1 = vld [vmem:[#allocation4] sm:$0xff]   ;;  %v504_v2 = vld [vmem:[#allocation4 + $0x8] sm:$0xff]  }
  0x49   :  { %455 = vmatprep.subr.bf16.mxu0 %v613_v0  ;;  %459 = vmatprep.mubr.msk.bf16.mxu0 %vm614_vm0, %v613_v0  ;;  %v77_v3 = vld [vmem:[#allocation2] sm:$0xff]  ;;  %vm100_vm1 = vcmask 261120   ;;  %v505_v5 = vld [vmem:[#allocation6] sm:$0xff]   ;;  %v507_v7 = vld [vmem:[#allocation6 + $0x10] sm:$0xff]  }
  0x4a   :  { %463 = vmatprep.subr.bf16.mxu1 %v613_v0  ;;  %467 = vmatprep.mubr.msk.bf16.mxu1 %vm614_vm0, %v613_v0  ;;  %v78_v4 = vpack.c.bf16 %v77_v3, %v77_v3  ;;  %v506_v6 = vld [vmem:[#allocation6 + $0x8] sm:$0xff]   ;;  %v508_v16 = vld [vmem:[#allocation6 + $0x18] sm:$0xff]   ;;  %v509_v17 = vld [vmem:[#allocation6 + $0x20] sm:$0xff]  }
  0x4b   :  { %456 = vmatpush3.bf16.msra.mxu0 %v503_v1  ;;  %464 = vmatpush3.bf16.msra.mxu1 %v505_v5  ;;  %v420_v8 = vld [vmem:[%s738_s3] ss:$0 sm:$0xff]  ;;  %v424_v18 = vld [vmem:[%s738_s3 + $0x1] ss:$0 sm:$0xff]  ;;  %v511_v27 = vld [vmem:[#allocation7] sm:$0xff]  }
  0x4c   :  { %457 = vmatprep.subr.bf16.mxu0 %v613_v0  ;;  %465 = vmatprep.subr.bf16.mxu1 %v613_v0  ;;  %v510_v26 = vld [vmem:[#allocation6 + $0x28] sm:$0xff]   ;;  %v512_v36 = vld [vmem:[#allocation7 + $0x8] sm:$0xff]  }
  0x4d   :  { %v428_v28 = vld [vmem:[%s738_s3 + $0x2] ss:$0 sm:$0xff]  ;;  %v432_v37 = vld [vmem:[%s738_s3 + $0x3] ss:$0 sm:$0xff]  ;;  %v436_v45 = vld [vmem:[%s740_s5] ss:$0 sm:$0xff] }
  0x4f   :  { %458 = vmatpush3.bf16.msra.mxu0 %v504_v2  ;;  %466 = vmatpush3.bf16.msra.mxu1 %v506_v6 }
  0x50   :  { %471 = vmatprep.subr.bf16.mxu0 %v613_v0  ;;  %479 = vmatprep.subr.bf16.mxu1 %v613_v0 }
  0x52   :  { %460 = vmatmul.mubr.msk.bf16.vlgmr.msra.gmra.mrb[0].mxu0 %vm100_vm1, %v78_v4 }
  0x53   :  { %475 = vmatprep.mubr.msk.bf16.mxu0 %vm614_vm0, %v613_v0  ;;  %472 = vmatpush3.bf16.msra.mxu0 %v507_v7 }
  0x54   :  { %473 = vmatprep.subr.bf16.mxu0 %v613_v0 }
  0x57   :  { %474 = vmatpush3.bf16.msra.mxu0 %v508_v16 }
  0x58   :  { %487 = vmatprep.subr.bf16.mxu0 %v613_v0 }
 0x125   :  { %v138_v9 = vpop.f32.mrb[0].mxu0 }
 0x126   :  { %v139_v10 = vadd.f32 %v420_v8, %v138_v9  ;;  %v461_v11 = vpop.f32.mrb[1].mxu0 }
 0x127   :  { %v141_v12 = vpop.f32.mrb[2].mxu0 }
 0x128   :  { %v144_v13 = vmax.f32 %v139_v10, 0.0  ;;  %v462_v14 = vpop.f32.mrb[3].mxu0 }
 0x12a   :  { %v145_v15 = vpack.c.bf16 %v144_v13, %v144_v13 }
 0x12c   :  { %468 = vmatmul.mubr.msk.bf16.vlgmr.msra.gmra.mrb[0].mxu1 %vm100_vm1, %v145_v15 }
 0x12d   :  { %483 = vmatprep.mubr.msk.bf16.mxu1 %vm614_vm0, %v613_v0  ;;  %480 = vmatpush3.bf16.msra.mxu1 %v509_v17 }
 0x12e   :  { %481 = vmatprep.subr.bf16.mxu1 %v613_v0 }
 0x131   :  { %482 = vmatpush3.bf16.msra.mxu1 %v510_v26 }
 0x1ff   :  { %v204_v19 = vpop.f32.mrb[0].mxu1 }
 0x200   :  { %v205_v20 = vadd.f32 %v424_v18, %v204_v19  ;;  %v469_v21 = vpop.f32.mrb[1].mxu1 }
 0x201   :  { %v207_v22 = vpop.f32.mrb[2].mxu1 }
 0x202   :  { %v210_v23 = vmax.f32 %v205_v20, 0.0  ;;  %v470_v24 = vpop.f32.mrb[3].mxu1 }
 0x204   :  { %v211_v25 = vpack.c.bf16 %v210_v23, %v210_v23 }
 0x206   :  { %476 = vmatmul.mubr.msk.bf16.vlgmr.msra.gmra.mrb[4].mxu0 %vm100_vm1, %v211_v25 }
 0x207   :  { %491 = vmatprep.mubr.msk.bf16.mxu0 %vm614_vm0, %v613_v0  ;;  %488 = vmatpush3.bf16.msra.mxu0 %v511_v27 }
 0x208   :  { %489 = vmatprep.subr.bf16.mxu0 %v613_v0 }
 0x20b   :  { %490 = vmatpush3.bf16.msra.mxu0 %v512_v36 }
 0x2d9   :  { %v271_v29 = vpop.f32.mrb[4].mxu0 }
 0x2da   :  { %v272_v30 = vadd.f32 %v428_v28, %v271_v29  ;;  %v477_v31 = vpop.f32.mrb[5].mxu0 }
 0x2db   :  { %v274_v32 = vpop.f32.mrb[6].mxu0 }
 0x2dc   :  { %v277_v33 = vmax.f32 %v272_v30, 0.0  ;;  %v478_v34 = vpop.f32.mrb[7].mxu0 }
 0x2de   :  { %v278_v35 = vpack.c.bf16 %v277_v33, %v277_v33 }
 0x2e0   :  { %484 = vmatmul.mubr.msk.bf16.vlgmr.msra.gmra.mrb[4].mxu1 %vm100_vm1, %v278_v35 }
 0x3b3   :  { %v338_v38 = vpop.f32.mrb[4].mxu1 }
 0x3b4   :  { %v339_v39 = vadd.f32 %v432_v37, %v338_v38  ;;  %v485_v40 = vpop.f32.mrb[5].mxu1 }
 0x3b5   :  { %v341_v41 = vpop.f32.mrb[6].mxu1 }
 0x3b6   :  { %v344_v42 = vmax.f32 %v339_v39, 0.0  ;;  %v486_v43 = vpop.f32.mrb[7].mxu1 }
 0x3b8   :  { %v345_v44 = vpack.c.bf16 %v344_v42, %v344_v42 }
 0x3ba   :  { %492 = vmatmul.mubr.msk.bf16.vlgmr.msra.gmra.mrb[8].mxu0 %vm100_vm1, %v345_v44 }
 0x48d   :  { %v406_v46 = vpop.f32.mrb[8].mxu0 }
 0x48e   :  { %v407_v47 = vadd.f32 %v436_v45, %v406_v46  ;;  %v493_v48 = vpop.f32.mrb[9].mxu0 }
 0x48f   :  { %v409_v49 = vpop.f32.mrb[10].mxu0 }
 0x490   :  { %412 = vst [vmem:[%s741_s6] sm:$0xff] %v407_v47  ;;  %v494_v50 = vpop.f32.mrb[11].mxu0 }
 0x491   :  { %417 = vsyncpa [#allocation3], 1 }
 0x492   :  { %418 = vsyncpa [#allocation5], 1 }
 0x493   :  { %419 = vsyncpa [#allocation8], 1 }

</bundles_post_ra>
